<compile_context>
chip_gen: v5e
topology: v5e:2x2
jax: 0.10.0
libtpu: 0.0.40
codegen_flags: <defaults>
</compile_context>

<pallas_src>
import functools

import jax
import jax.numpy as jnp
from jax.experimental import pallas as pl
from jax.experimental.pallas import tpu as pltpu


def _round_up(a, m):
    return ((a + m - 1) // m) * m


def _dwconv_kernel(x_ref, w_ref, b_ref, o_ref, xpad_ref, *,
                   K, d, stride, H, W, Ho, Wo, pad, off_h, off_w):
    # x_ref   : (H, W)     one (image, channel) plane, VMEM
    # w_ref   : (C, K*K)   fused depthwise weights (f32), SMEM
    # b_ref   : (C,)       fused bias (f32), SMEM
    # o_ref   : (Ho, Wo)   output plane, VMEM
    # xpad_ref: (Hs, Ws)   scratch: zero-padded input plane, VMEM
    c = pl.program_id(1)

    # Build the zero-padded plane.  Zero the whole scratch (offset-free store),
    # then drop the image in at a tile-aligned offset (off_h % 8 == 0,
    # off_w % 128 == 0, and off_h, off_w >= pad), so no unaligned stores exist.
    xpad_ref[...] = jnp.zeros(xpad_ref.shape, xpad_ref.dtype)
    xpad_ref[off_h:off_h + H, off_w:off_w + W] = x_ref[...]

    acc = jnp.full((Ho, Wo), b_ref[c], dtype=jnp.float32)
    for kh in range(K):
        for kw in range(K):
            h0 = off_h - pad + kh * d
            w0 = off_w - pad + kw * d
            if stride == 1:
                patch = xpad_ref[h0:h0 + Ho, w0:w0 + Wo]
            else:
                # TODO(synk): stride > 1 path is untested; strided lane loads
                # may need a phase decomposition on some generations.
                patch = xpad_ref[pl.ds(h0, Ho, stride=stride),
                                 pl.ds(w0, Wo, stride=stride)]
            acc = acc + patch.astype(jnp.float32) * w_ref[c, kh * K + kw]

    o_ref[...] = acc.astype(o_ref.dtype)


def channelwise_dilated_conv33(x_nchw, w_dw, b_dw, w_11, b_11, *, stride=1, d=1):
    """Forward pass of ChannelWiseDilatedConv_33 (fused depthwise + 1x1).

    x_nchw: (N, C, H, W)   input (PyTorch NCHW layout)
    w_dw  : (C, 1, K, K)   depthwise conv weight (groups = C)
    b_dw  : (C,)           depthwise conv bias
    w_11  : (C, 1, 1, 1)   1x1 grouped conv weight (groups = C)
    b_11  : (C,)           1x1 grouped conv bias
    """
    N, C, H, W = x_nchw.shape
    K = w_dw.shape[-1]
    assert K % 2 == 1, "padding formula assumes odd kernel size"
    pad = ((K - 1) // 2) * d
    eff_k = (K - 1) * d + 1
    Ho = (H + 2 * pad - eff_k) // stride + 1
    Wo = (W + 2 * pad - eff_k) // stride + 1

    # Tile-aligned interior offsets inside the padded scratch plane.
    off_h = _round_up(pad, 8)
    off_w = _round_up(pad, 128)
    Hs = off_h + H + pad
    Ws = off_w + W + pad

    # Fold the per-channel 1x1 conv into the depthwise conv:
    #   (dw(x) + b_dw) * s + b_11 == dw_{s*w}(x) + (b_dw*s + b_11)
    scale = w_11[:, 0, 0, 0].astype(jnp.float32)                        # (C,)
    w_f = (w_dw[:, 0, :, :].astype(jnp.float32)
           * scale[:, None, None]).reshape(C, K * K)                    # (C, K*K)
    b_f = b_dw.astype(jnp.float32) * scale + b_11.astype(jnp.float32)   # (C,)

    kernel = functools.partial(
        _dwconv_kernel, K=K, d=d, stride=stride,
        H=H, W=W, Ho=Ho, Wo=Wo, pad=pad, off_h=off_h, off_w=off_w)

    return pl.pallas_call(
        kernel,
        out_shape=jax.ShapeDtypeStruct((N, C, Ho, Wo), x_nchw.dtype),
        grid_spec=pltpu.PrefetchScalarGridSpec(
            num_scalar_prefetch=0,
            grid=(N, C),
            in_specs=[
                # One (H, W) plane per grid step; W on lanes, H on sublanes.
                pl.BlockSpec((None, None, H, W), lambda n, c: (n, c, 0, 0)),
                # Fused per-channel weights / bias as SMEM scalars.
                pl.BlockSpec(memory_space=pltpu.MemorySpace.SMEM),
                pl.BlockSpec(memory_space=pltpu.MemorySpace.SMEM),
            ],
            out_specs=pl.BlockSpec((None, None, Ho, Wo),
                                   lambda n, c: (n, c, 0, 0)),
            scratch_shapes=[pltpu.VMEM((Hs, Ws), x_nchw.dtype)],
        ),
        compiler_params=pltpu.CompilerParams(
            dimension_semantics=("parallel", "parallel"),
            # >= default scoped limit on every generation (v5e default is 16 MiB),
            # well under physical VMEM everywhere (v7x = 64 MiB).
            vmem_limit_bytes=32 * 1024 * 1024,
        ),
    )(x_nchw, w_f, b_f)


def _reference(x_nchw, w_dw, b_dw, w_11, b_11, *, stride, d):
    C = x_nchw.shape[1]
    K = w_dw.shape[-1]
    pad = ((K - 1) // 2) * d
    y = jax.lax.conv_general_dilated(
        x_nchw, w_dw,
        window_strides=(stride, stride),
        padding=[(pad, pad), (pad, pad)],
        rhs_dilation=(d, d),
        dimension_numbers=("NCHW", "OIHW", "NCHW"),
        feature_group_count=C)
    y = y + b_dw[None, :, None, None]
    y = y * w_11[:, 0, 0, 0][None, :, None, None] + b_11[None, :, None, None]
    return y


if __name__ == "__main__":
    # Small deterministic example consistent with the module (nIn == nOut == C).
    N, C, H, W = 2, 4, 16, 16
    K, stride, d = 3, 1, 2

    key = jax.random.PRNGKey(0)
    k1, k2, k3, k4, k5 = jax.random.split(key, 5)
    x = jax.random.normal(k1, (N, C, H, W), dtype=jnp.float32)
    w_dw = jax.random.normal(k2, (C, 1, K, K), dtype=jnp.float32) * 0.1
    b_dw = jax.random.normal(k3, (C,), dtype=jnp.float32) * 0.1
    w_11 = jax.random.normal(k4, (C, 1, 1, 1), dtype=jnp.float32) * 0.1
    b_11 = jax.random.normal(k5, (C,), dtype=jnp.float32) * 0.1

    out = channelwise_dilated_conv33(x, w_dw, b_dw, w_11, b_11, stride=stride, d=d)
    out = jax.block_until_ready(out)

    ref = _reference(x, w_dw, b_dw, w_11, b_11, stride=stride, d=d)
    assert out.shape == ref.shape, (out.shape, ref.shape)
    assert jnp.allclose(out, ref, atol=1e-4, rtol=1e-4), "mismatch vs reference"

    print("KERNEL_OK")
</pallas_src>

<mosaic_0001>
module attributes {stable_mosaic.version = 11 : i64} {
  func.func @_dwconv_kernel(%arg0: i32, %arg1: i32, %arg2: memref<1x1x16x16xf32, #tpu.memory_space<vmem>>, %arg3: memref<4x9xf32, #tpu.memory_space<smem>>, %arg4: memref<4xf32, #tpu.memory_space<smem>>, %arg5: memref<1x1x16x16xf32, #tpu.memory_space<vmem>>, %arg6: memref<26x146xf32, #tpu.memory_space<vmem>>) attributes {dimension_semantics = [#tpu.dimension_semantics<parallel>, #tpu.dimension_semantics<parallel>], iteration_bounds = array<i64: 2, 4>, scalar_prefetch = 0 : i64, scratch_operands = 1 : i64, tpu.core_type = #tpu.core_type<tc>, window_params = [{transform_indices = @transform_0, window_bounds = array<i64: 1, 1, 16, 16>}, {transform_indices = @transform_1, window_bounds = array<i64: 4, 9>}, {transform_indices = @transform_2, window_bounds = array<i64: 4>}, {transform_indices = @transform_3, window_bounds = array<i64: 1, 1, 16, 16>}]} {
    %cst = arith.constant 0.000000e+00 : f32
    %0 = vector.broadcast %cst : f32 to vector<26x146xf32>
    %c0 = arith.constant 0 : index
    %c0_0 = arith.constant 0 : index
    %1 = vector.load %arg6[%c0, %c0_0] : memref<26x146xf32, #tpu.memory_space<vmem>>, vector<26x146xf32>
    tpu.vector_store %arg6[%c0, %c0_0], %0 {strides = array<i32>} : memref<26x146xf32, #tpu.memory_space<vmem>>, vector<26x146xf32>,
    %c0_1 = arith.constant 0 : index
    %c0_2 = arith.constant 0 : index
    %c0_3 = arith.constant 0 : index
    %c0_4 = arith.constant 0 : index
    %2 = vector.load %arg2[%c0_1, %c0_2, %c0_3, %c0_4] : memref<1x1x16x16xf32, #tpu.memory_space<vmem>>, vector<1x1x16x16xf32>
    %3 = vector.shape_cast %2 : vector<1x1x16x16xf32> to vector<16x16xf32>
    %c8 = arith.constant 8 : index
    %c128 = arith.constant 128 : index
    %4 = vector.load %arg6[%c8, %c128] : memref<26x146xf32, #tpu.memory_space<vmem>>, vector<16x16xf32>
    tpu.vector_store %arg6[%c8, %c128], %3 {strides = array<i32>} : memref<26x146xf32, #tpu.memory_space<vmem>>, vector<16x16xf32>,
    %5 = arith.index_cast %arg1 : i32 to index
    %6 = memref.load %arg4[%5] : memref<4xf32, #tpu.memory_space<smem>>
    %7 = vector.broadcast %6 : f32 to vector<16x16xf32>
    %c6 = arith.constant 6 : index
    %c126 = arith.constant 126 : index
    %8 = vector.load %arg6[%c6, %c126] : memref<26x146xf32, #tpu.memory_space<vmem>>, vector<16x16xf32>
    %9 = arith.index_cast %arg1 : i32 to index
    %c0_5 = arith.constant 0 : index
    %10 = memref.load %arg3[%9, %c0_5] : memref<4x9xf32, #tpu.memory_space<smem>>
    %11 = vector.broadcast %10 : f32 to vector<16x16xf32>
    %12 = arith.mulf %8, %11 : vector<16x16xf32>
    %13 = arith.addf %7, %12 : vector<16x16xf32>
    %c6_6 = arith.constant 6 : index
    %c128_7 = arith.constant 128 : index
    %14 = vector.load %arg6[%c6_6, %c128_7] : memref<26x146xf32, #tpu.memory_space<vmem>>, vector<16x16xf32>
    %15 = arith.index_cast %arg1 : i32 to index
    %c1 = arith.constant 1 : index
    %16 = memref.load %arg3[%15, %c1] : memref<4x9xf32, #tpu.memory_space<smem>>
    %17 = vector.broadcast %16 : f32 to vector<16x16xf32>
    %18 = arith.mulf %14, %17 : vector<16x16xf32>
    %19 = arith.addf %13, %18 : vector<16x16xf32>
    %c6_8 = arith.constant 6 : index
    %c130 = arith.constant 130 : index
    %20 = vector.load %arg6[%c6_8, %c130] : memref<26x146xf32, #tpu.memory_space<vmem>>, vector<16x16xf32>
    %21 = arith.index_cast %arg1 : i32 to index
    %c2 = arith.constant 2 : index
    %22 = memref.load %arg3[%21, %c2] : memref<4x9xf32, #tpu.memory_space<smem>>
    %23 = vector.broadcast %22 : f32 to vector<16x16xf32>
    %24 = arith.mulf %20, %23 : vector<16x16xf32>
    %25 = arith.addf %19, %24 : vector<16x16xf32>
    %c8_9 = arith.constant 8 : index
    %c126_10 = arith.constant 126 : index
    %26 = vector.load %arg6[%c8_9, %c126_10] : memref<26x146xf32, #tpu.memory_space<vmem>>, vector<16x16xf32>
    %27 = arith.index_cast %arg1 : i32 to index
    %c3 = arith.constant 3 : index
    %28 = memref.load %arg3[%27, %c3] : memref<4x9xf32, #tpu.memory_space<smem>>
    %29 = vector.broadcast %28 : f32 to vector<16x16xf32>
    %30 = arith.mulf %26, %29 : vector<16x16xf32>
    %31 = arith.addf %25, %30 : vector<16x16xf32>
    %c8_11 = arith.constant 8 : index
    %c128_12 = arith.constant 128 : index
    %32 = vector.load %arg6[%c8_11, %c128_12] : memref<26x146xf32, #tpu.memory_space<vmem>>, vector<16x16xf32>
    %33 = arith.index_cast %arg1 : i32 to index
    %c4 = arith.constant 4 : index
    %34 = memref.load %arg3[%33, %c4] : memref<4x9xf32, #tpu.memory_space<smem>>
    %35 = vector.broadcast %34 : f32 to vector<16x16xf32>
    %36 = arith.mulf %32, %35 : vector<16x16xf32>
    %37 = arith.addf %31, %36 : vector<16x16xf32>
    %c8_13 = arith.constant 8 : index
    %c130_14 = arith.constant 130 : index
    %38 = vector.load %arg6[%c8_13, %c130_14] : memref<26x146xf32, #tpu.memory_space<vmem>>, vector<16x16xf32>
    %39 = arith.index_cast %arg1 : i32 to index
    %c5 = arith.constant 5 : index
    %40 = memref.load %arg3[%39, %c5] : memref<4x9xf32, #tpu.memory_space<smem>>
    %41 = vector.broadcast %40 : f32 to vector<16x16xf32>
    %42 = arith.mulf %38, %41 : vector<16x16xf32>
    %43 = arith.addf %37, %42 : vector<16x16xf32>
    %c10 = arith.constant 10 : index
    %c126_15 = arith.constant 126 : index
    %44 = vector.load %arg6[%c10, %c126_15] : memref<26x146xf32, #tpu.memory_space<vmem>>, vector<16x16xf32>
    %45 = arith.index_cast %arg1 : i32 to index
    %c6_16 = arith.constant 6 : index
    %46 = memref.load %arg3[%45, %c6_16] : memref<4x9xf32, #tpu.memory_space<smem>>
    %47 = vector.broadcast %46 : f32 to vector<16x16xf32>
    %48 = arith.mulf %44, %47 : vector<16x16xf32>
    %49 = arith.addf %43, %48 : vector<16x16xf32>
    %c10_17 = arith.constant 10 : index
    %c128_18 = arith.constant 128 : index
    %50 = vector.load %arg6[%c10_17, %c128_18] : memref<26x146xf32, #tpu.memory_space<vmem>>, vector<16x16xf32>
    %51 = arith.index_cast %arg1 : i32 to index
    %c7 = arith.constant 7 : index
    %52 = memref.load %arg3[%51, %c7] : memref<4x9xf32, #tpu.memory_space<smem>>
    %53 = vector.broadcast %52 : f32 to vector<16x16xf32>
    %54 = arith.mulf %50, %53 : vector<16x16xf32>
    %55 = arith.addf %49, %54 : vector<16x16xf32>
    %c10_19 = arith.constant 10 : index
    %c130_20 = arith.constant 130 : index
    %56 = vector.load %arg6[%c10_19, %c130_20] : memref<26x146xf32, #tpu.memory_space<vmem>>, vector<16x16xf32>
    %57 = arith.index_cast %arg1 : i32 to index
    %c8_21 = arith.constant 8 : index
    %58 = memref.load %arg3[%57, %c8_21] : memref<4x9xf32, #tpu.memory_space<smem>>
    %59 = vector.broadcast %58 : f32 to vector<16x16xf32>
    %60 = arith.mulf %56, %59 : vector<16x16xf32>
    %61 = arith.addf %55, %60 : vector<16x16xf32>
    %c0_22 = arith.constant 0 : index
    %c0_23 = arith.constant 0 : index
    %c0_24 = arith.constant 0 : index
    %c0_25 = arith.constant 0 : index
    %62 = vector.load %arg5[%c0_22, %c0_23, %c0_24, %c0_25] : memref<1x1x16x16xf32, #tpu.memory_space<vmem>>, vector<1x1x16x16xf32>
    %63 = vector.shape_cast %62 : vector<1x1x16x16xf32> to vector<16x16xf32>
    %64 = vector.shape_cast %61 : vector<16x16xf32> to vector<1x1x16x16xf32>
    tpu.vector_store %arg5[%c0_22, %c0_23, %c0_24, %c0_25], %64 {strides = array<i32>} : memref<1x1x16x16xf32, #tpu.memory_space<vmem>>, vector<1x1x16x16xf32>,
    return
  }
  func.func @transform_0(%arg0: i32, %arg1: i32) -> (i32, i32, i32, i32) {
    %c0_i32 = arith.constant 0 : i32
    %c0_i32_0 = arith.constant 0 : i32
    %c0_i32_1 = arith.constant 0 : i32
    return %arg0, %arg1, %c0_i32, %c0_i32_0 : i32, i32, i32, i32
  }
  func.func @transform_1(%arg0: i32, %arg1: i32) -> (i32, i32) {
    %c0_i32 = arith.constant 0 : i32
    %c0_i32_0 = arith.constant 0 : i32
    %c0_i32_1 = arith.constant 0 : i32
    return %c0_i32, %c0_i32_0 : i32, i32
  }
  func.func @transform_2(%arg0: i32, %arg1: i32) -> i32 {
    %c0_i32 = arith.constant 0 : i32
    %c0_i32_0 = arith.constant 0 : i32
    return %c0_i32 : i32
  }
  func.func @transform_3(%arg0: i32, %arg1: i32) -> (i32, i32, i32, i32) {
    %c0_i32 = arith.constant 0 : i32
    %c0_i32_0 = arith.constant 0 : i32
    %c0_i32_1 = arith.constant 0 : i32
    return %arg0, %arg1, %c0_i32, %c0_i32_0 : i32, i32, i32, i32
  }
}

</mosaic_0001>

<bundles_post_ra>
// kernel: tpu_custom_call.1
= control target key start
LH: loop header
LB: loop body
LE: loop exit
PB: predicated region body
PF: predicated region fallthrough
CT: control target
= control target key end

     0   :  { %s1271_s0 = inlined_call_operand.hbm [shape: f32[2,4,16,16], index: 0, kind: input, shape index: {}]   ;;  %s1272_s1 = inlined_call_operand.hbm [shape: f32[4,9], index: 1, kind: input, shape index: {}]   ;;  %s1273_s2 = inlined_call_operand.vmem [shape: f32[4], index: 2, kind: input, shape index: {}]   ;;  %s1274_s3 = inlined_call_operand.hbm [shape: f32[2,4,16,16], index: 3, kind: output, shape index: {}]  }
   0x1   :  { %1281 = sst [smem:[#allocation20_spill]] %s1272_s1 }
   0x2   :  { %1282 = sst [smem:[#allocation21_spill]] %s1273_s2 }
   0x3   :  { %8 = vsyncpa [#allocation4], 0 }
   0x4   :  { %10 = vsyncpa [#allocation4 + $0x1], 0 }
   0x5   :  { %11 = vsyncpa [#allocation6], 0 }
   0x6   :  { %12 = vsyncpa [#allocation7], 0 }
   0x7   :  { %13 = vsyncpa [#allocation5], 0 }
   0x8   :  { %15 = vsyncpa [#allocation5 + $0x1], 0  ;;  %s995_s12 = smov 0   ;;  %s997_s13 = smov 0  }
   0x9   :  { %s999_s14 = smov 0   ;;  %s1001_s15 = smov 0  }
   0xa   :  { %s1003_s16 = smov 0   ;;  %s1005_s17 = smov 0  }
   0xb   :  { %s1007_s18 = smov 0   ;;  %s1009_s19 = smov 0  }
   0xc LB: > { %1283 = sst [smem:[#allocation15_spill]] %s935_s12  ;;  %s668_s20 = sadd.s32 4294967295, %s963_s19   ;;  %s963_s19 = sphi %s1009_s19, %s21_s19   ;;  %s959_s18 = sphi %s1007_s18, %s1308_s18   ;;  %s955_s17 = sphi %s1005_s17, %s1303_s17   ;;  %s951_s16 = sphi %s1003_s16, %s1307_s16   ;;  %s947_s15 = sphi %s1001_s15, %s1302_s15   ;;  %s943_s14 = sphi %s999_s14, %s1306_s14   ;;  %s939_s13 = sphi %s997_s13, %s1305_s13   ;;  %s935_s12 = sphi %s995_s12, %s1304_s12  }
   0xd   : > { %1284 = sst [smem:[#allocation16_spill]] %s955_s17  ;;  %s669_s21 = sadd.s32 4294967294, %s963_s19  }
   0xe   : > { %1285 = sst [smem:[#allocation17_spill]] %s963_s19  ;;  %p49_p0 = scmp.ne.s32.totalorder %s943_s14, %s939_s13 }
   0xf   : > { %p50_p1 = scmp.eq.s32.totalorder %s963_s19, 0  ;;  %p55_p2 = scmp.ne.s32.totalorder %s939_s13, %s935_s12 }
  0x10   : > { %p1043_p3 = scmp.eq.s32.totalorder %s668_s20, 0  ;;  %p123_p4 = scmp.eq.s32.totalorder %s668_s20, 7 }
  0x11   : > { %p1047_p5 = por %p50_p1, %p49_p0  ;;  %p129_p6 = scmp.eq.s32.totalorder %s669_s21, 7 }
  0x12   : > { %p1053_p7 = por %p1043_p3, %p55_p2  ;;  %p1057_p8 = por %p123_p4, %p49_p0 }
  0x13   : > { %p1061_p9 = por %p129_p6, %p55_p2  ;;  %p670_p10 = scmp.ge.s32.totalorder %s963_s19, 1 }
  0x14   : > { %p136_p11 = scmp.lt.s32.totalorder %s963_s19, 9  ;;  %s1292_s1 = sld [smem:[#allocation20_spill]] }
  0x15   : > { %s1290_s27 = scalar_select %p1061_p9, 1, 0 }
  0x16   : > { %p1070_p12 = pnand %p670_p10, %p136_p11  ;;  %p719_p13 = scmp.lt.s32.totalorder %s963_s19, 8 }
  0x17   : > { %1291 = sst [smem:[#allocation18_spill]] %s1290_s27  ;;  %s965_s9 = smov [#allocation8]  }
  0x18   : > { %p702_p0 = pneg %p1070_p12  ;;  %s1294_s2 = sld [smem:[#allocation21_spill]] }
  0x19   : > { %p1082_p1 = pnand %p719_p13, %p1047_p5  ;;  %s966_s10 = smov [#allocation9]  }
  0x1a   : > { %s148_s30 = sshll.u32 %s1292_s1, 4  ;;  %p703_p2 = pnand %p702_p0, %p1043_p3  ;;  %s149_s30 = int_to_ptr.hbm [resolvable:$true] %s148_s30 }
  0x1b   : > { %s30_s11 = sadd.s32 1, %s955_s17  ;;  %s33_s20 = sadd.s32 1, %s959_s18 }
  0x1c   : > { %705 = dma.hbm_to_smem (!%p703_p2), %s149_s30, 64, %s965_s9, [#allocation6]  }
  0x1d   : > { %p31_p4 = scmp.ge.s32.totalorder %s30_s11, 4  ;;  %s169_s21 = sand.u32 1, %s943_s14  }
  0x1e   : > { %s158_s7 = sshll.u32 %s1294_s2, 4  ;;  %s674_s28 = sshll.u32 %s169_s21, 4  ;;  %s159_s7 = int_to_ptr.vmem [resolvable:$true] %s158_s7 }
  0x1f   : > { %708 = dma.vmem_to_smem (!%p703_p2), %s159_s7, 16, %s966_s10, [#allocation7]  }
  0x20   : > { %s1310_s11 = smov (%p31_p4, %s30_s11), 0  ;;  %s1312_s20 = smov (!%p31_p4, %s33_s20), %s959_s18 }
  0x21   : > { %1296 = sst [smem:[#allocation19_spill]] %s1310_s11  ;;  %s38_s24 = ssub.s32 %s955_s17, %s1310_s11 }
  0x22   : > { %p35_p5 = scmp.ge.s32.totalorder %s1312_s20, 2  ;;  %s675_s29 = sshll.u32 %s955_s17, 1 }
  0x23   : > { %s676_s5 = sshll.u32 %s959_s18, 3  ;;  %s173_s6 = scalar_lea.vmem [#allocation3], %s674_s28 }
  0x24   : > { %s183_s30 = sshll.u32 %s173_s6, 4  ;;  %s1314_s20 = smov (%p35_p5, %s1312_s20), 0  ;;  %s184_s30 = int_to_ptr.vmem [resolvable:$true] %s183_s30 }
  0x25   : > { %s178_s7 = sadd.s32 %s676_s5, %s675_s29  ;;  %s37_s9 = ssub.s32 %s959_s18, %s1314_s20 }
  0x26   : > { %s677_s10 = sshll.u32 %s178_s7, 3  ;;  %s39_s22 = sor.u32 %s38_s24, %s37_s9 }
  0x27   : > { %s180_s11 = scalar_lea.hbm %s1271_s0, %s677_s10  ;;  %p40_p6 = scmp.eq.s32.totalorder %s39_s22, 0 }
  0x28   : > { %s181_s27 = sshll.u32 %s180_s11, 4  ;;  %s1297_s17 = sadd.s32 1, %s943_s14  ;;  %s182_s27 = int_to_ptr.hbm [resolvable:$true] %s181_s27 }
  0x29   : > { %s1108_s12 = scalar_select %p40_p6, %s943_s14, %s1297_s17  }
  0x2a   : > { %s170_s28 = scalar_lea.sflag [#allocation4], %s169_s21  ;;  %s967_s6 = smov 128  }
  0x2b   : > { %s968_s19 = smov 8   ;;  %195 = sbr.rel (%p1070_p12) target bundleno = 353 (0x161), region = 32 }
  0x2c   : > { %712 = dma.hbm_to_vmem [thread:$0]  (!%p1082_p1), %s182_s27, 256, %s184_s30, %s170_s28, %s967_s6, %s967_s6, %s968_s19  }
  0x2d   : > { %s1115_s24 = sand.u32 (!%p1070_p12), 1, %s939_s13  }
  0x2e   : > { %s679_s1 = sshll.u32 (!%p1070_p12), %s1115_s24, 4  ;;  %s198_s2 = scalar_lea.sflag (!%p1070_p12), [#allocation4], %s1115_s24 }
  0x2f   : > { %s201_s17 = scalar_lea.vmem (!%p1070_p12), [#allocation3], %s679_s1 }
  0x30   : > { %918 = dma.done.wait (%p1053_p7), %s198_s2, 256  }
  0x31   : > { %920 = vsyncadd (%p1053_p7), %s198_s2, 4294967040 }
  0x32   : > { %922 = dma.done.wait (%p1043_p3), [#allocation6], 64  }
  0x33   : > { %924 = vsyncadd (%p1043_p3), [#allocation6], 4294967232 }
  0x34   : > { %926 = dma.done.wait (%p1043_p3), [#allocation7], 16  }
  0x35   : > { %928 = vsyncadd (%p1043_p3), [#allocation7], 4294967280 }
  0x36   : > { %217 = sfence }
  0x37   : > { %vm237_vm0 = vcmask 146432   ;;  %s1134_s19 = sshll.u32 %s947_s15, 7  ;;  %v969_v0 = vmov 0.0   ;;  %v246_v1 = vld [vmem:[%s201_s17] sm:$0xff]  ;;  %vm248_vm1 = vcmask 130048   ;;  %v247_v2 = vld [vmem:[%s201_s17 + $0x8] sm:$0xff] }
  0x38   : > { %238 = vst.msk [vmem:[#allocation2 + $0x8] sm:$0xff] %vm237_vm0, %v969_v0  ;;  %s298_s22 = sadd.s32 2, %s1134_s19  ;;  %s274_s25 = sadd.s32 1, %s1134_s19  ;;  %vm244_vm2 = vcmask 140288   ;;  %vm335_vm3 = vcmask 1045504   ;;  %vm425_vm4 = vcmask 1043456  }
  0x39   : > { %240 = vst.msk [vmem:[#allocation2 + $0x18] sm:$0xff] %vm237_vm0, %v969_v0  ;;  %s299_s27 = sld [smem:[#allocation8 + %s298_s22]]  ;;  %s354_s8 = sadd.s32 4, %s1134_s19  ;;  %vm524_vm5 = vcmask 15360   ;;  %vm531_vm6 = vcmask 130054   ;;  %vm534_vm7 = vcmask 128000  }
  0x3a   : > { %242 = vst.msk [vmem:[#allocation2 + $0x28] sm:$0xff] %vm237_vm0, %v969_v0  ;;  %s275_s4 = sld [smem:[#allocation8 + %s274_s25]]  ;;  %s379_s11 = sadd.s32 5, %s1134_s19 }
  0x3b   : > { %236 = vst [vmem:[#allocation2] sm:$0xff] %v969_v0  ;;  %s355_s23 = sld [smem:[#allocation8 + %s354_s8]]  ;;  %s970_s21 = smov 124  }
  0x3c   : > { %239 = vst [vmem:[#allocation2 + $0x10] sm:$0xff] %v969_v0  ;;  %s971_s29 = smov 126   ;;  %s380_s5 = sld [smem:[#allocation8 + %s379_s11]] }
  0x3d   : > { %241 = vst [vmem:[#allocation2 + $0x20] sm:$0xff] %v969_v0  ;;  %s448_s30 = sadd.s32 7, %s1134_s19  ;;  %s477_s9 = sadd.s32 8, %s1134_s19 }
  0x3e   : > { %243 = vst [vmem:[#allocation2 + $0x30] sm:$0x3] %v969_v0  ;;  %s449_s7 = sld [smem:[#allocation8 + %s448_s30]]  ;;  %s324_s6 = sadd.s32 3, %s1134_s19 }
  0x3f   : > { %v1139_v3 = vld [vmem:[#allocation2 + $0x8] sm:$0xc0]  ;;  %v300_v4 = vstv %s299_s27  ;;  %249 = vst.msk [vmem:[#allocation2 + $0x18] sm:$0xff] %vm248_vm1, %v246_v1  ;;  %s478_s10 = sld [smem:[#allocation8 + %s477_s9]]  ;;  %s410_s22 = sadd.s32 6, %s1134_s19 }
  0x40   : > { %v301_v5 = vmul.f32 %v300_v4, %v1139_v3  ;;  %v276_v6 = vstv %s275_s4  ;;  %250 = vst.msk [vmem:[#allocation2 + $0x28] sm:$0xff] %vm248_vm1, %v247_v2  ;;  %s260_s28 = sld [smem:[#allocation8 + %s1134_s19]]  ;;  %s972_s19 = smov 2  }
  0x41   : > { %v277_v7 = vmul.f32 %v276_v6, %v1139_v3  ;;  %245 = vst.msk [vmem:[#allocation2 + $0x38] sm:$0x3] %vm244_vm2, %v969_v0  ;;  %v356_v8 = vstv %s355_s23  ;;  %s251_s2 = sld [smem:[#allocation9 + %s947_s15]]  ;;  %s685_s27 = sshll.u32 %s947_s15, 1 }
  0x42   : > { %307 = vrot.lane.b32.xlu1 %v301_v5, %s970_s21  ;;  %v381_v19 = vstv %s380_s5  ;;  %s325_s17 = sld [smem:[#allocation8 + %s324_s6]]  ;;  %v253_v54 = vld [vmem:[#allocation2] sm:$0xc0]  ;;  %s686_s4 = sshll.u32 %s951_s16, 3 }
  0x43   : > { %283 = vrot.lane.b32.xlu0 %v277_v7, %s971_s29  ;;  %s411_s25 = sld [smem:[#allocation8 + %s410_s22]]  ;;  %s548_s8 = sadd.s32 %s686_s4, %s685_s27 }
  0x44   : > { %v450_v27 = vstv %s449_s7  ;;  %v257_v55 = vld [vmem:[#allocation2 + $0x20] sm:$0x3f]  ;;  %s687_s23 = sshll.u32 %s548_s8, 3  ;;  %s235_s11 = scalar_lea.vmem [#allocation10], %s679_s1 }
  0x45   : > { %v479_v34 = vstv %s478_s10  ;;  %s550_s5 = scalar_lea.hbm %s1274_s3, %s687_s23  ;;  %s551_s30 = sshll.u32 %s235_s11, 4  ;;  %s552_s30 = int_to_ptr.vmem [resolvable:$true] %s551_s30 }
  0x46   : > { %v1148_v9 = vld [vmem:[#allocation2 + $0x18] sm:$0xff]  ;;  %v261_v53 = vstv %s260_s28  ;;  %s553_s15 = sshll.u32 %s550_s5, 4  ;;  %s537_s16 = scalar_lea.sflag [#allocation5], %s1115_s24  ;;  %s554_s15 = int_to_ptr.hbm [resolvable:$true] %s553_s15 }
  0x47   : > { %v1150_v10 = vld [vmem:[#allocation2 + $0x28] sm:$0x3f]  ;;  %v278_v11 = vmul.f32 %v276_v6, %v1148_v9  ;;  %v302_v12 = vmul.f32 %v300_v4, %v1148_v9  ;;  %v357_v14 = vmul.f32 %v356_v8, %v1148_v9  ;;  %v382_v22 = vmul.f32 %v381_v19, %v1148_v9  ;;  %v1171_v26 = vld [vmem:[#allocation2 + $0x18] sm:$0xfc]  ;;  %s871_s1 = sshra.s32 %s554_s15, 4  ;;  %s877_s28 = scalar_lea.hbm %s1274_s3, 128  ;;  %s872_s1 = int_to_ptr.hbm [resolvable:$true] %s871_s1 }
  0x48   : > { %v1154_v13 = vld [vmem:[#allocation2 + $0x28] sm:$0xff]  ;;  %v279_v15 = vmul.f32 %v276_v6, %v1150_v10  ;;  %v303_v20 = vmul.f32 %v300_v4, %v1150_v10  ;;  %v451_v29 = vmul.f32 %v450_v27, %v1171_v26  ;;  %v1179_v33 = vld [vmem:[#allocation2 + $0x38] sm:$0x3]  ;;  %v480_v37 = vmul.f32 %v479_v34, %v1171_v26  ;;  %s873_s7 = scalar_lea.hbm %s872_s1, 16  ;;  %p878_p11 = scmp.lt.s32.totalorder %s872_s1, %s1274_s3 }
  0x49   : > { %v358_v16 = vmul.f32 %v356_v8, %v1154_v13  ;;  %309 = vrot.lane.b32.xlu2 %v302_v12, %s970_s21  ;;  %v361_v17 = vrot.slane %v357_v14, 2  ;;  %v383_v23 = vmul.f32 %v381_v19, %v1154_v13  ;;  %v386_v24 = vrot.slane %v382_v22, 2  ;;  %p874_p3 = scmp.ne.s32.totalorder %s872_s1, %s873_s7  ;;  %p879_p12 = scmp.lt.s32.totalorder %s877_s28, %s873_s7 }
  0x4a   : > { %287 = vrot.lane.b32.xlu1 %v279_v15, %s971_s29  ;;  %v452_v30 = vmul.f32 %v450_v27, %v1154_v13  ;;  %v457_v31 = vrot.slane %v451_v29, 4  ;;  %v453_v35 = vmul.f32 %v450_v27, %v1179_v33  ;;  %v481_v38 = vmul.f32 %v479_v34, %v1154_v13 }
  0x4b   : > { %285 = vrot.lane.b32.xlu0 %v278_v11, %s971_s29  ;;  %v362_v18 = vrot.slane %v358_v16, 2  ;;  %v387_v25 = vrot.slane %v383_v23, 2  ;;  %v486_v40 = vrot.slane %v480_v37, 4  ;;  %v482_v43 = vmul.f32 %v479_v34, %v1179_v33  ;;  %p875_p7 = pnand %p874_p3, %p1057_p8  ;;  %p880_p13 = por %p879_p12, %p878_p11 }
  0x4c   : > { %v458_v32 = vrot.slane %v452_v30, 4  ;;  %v460_v39 = vrot.slane %v453_v35, 4  ;;  %v487_v41 = vrot.slane %v481_v38, 4  ;;  %v267_v56 = vmul.f32 %v261_v53, %v1150_v10  ;;  %v408_v35 = vld [vmem:[#allocation2 + $0x30] sm:$0x3] }
  0x4d   : > { %v363_v21 = vsel %vm335_vm3, %v361_v17, %v362_v18  ;;  %v388_v28 = vsel %vm335_vm3, %v386_v24, %v387_v25  ;;  %v489_v45 = vrot.slane %v482_v43, 4  ;;  %v264_v57 = vmul.f32 0.0, %v261_v53  ;;  %p876_p10 = pneg %p875_p7 }
  0x4e   : > { %v459_v36 = vsel %vm425_vm4, %v457_v31, %v458_v32  ;;  %v461_v42 = vsel %vm425_vm4, %v458_v32, %v460_v39  ;;  %v488_v44 = vsel %vm425_vm4, %v486_v40, %v487_v41  ;;  %v262_v58 = vmul.f32 %v261_v53, %v253_v54 }
  0x4f   : > { %v490_v46 = vsel %vm425_vm4, %v487_v41, %v489_v45  ;;  %v263_v59 = vmul.f32 %v261_v53, %v1139_v3  ;;  %v266_v60 = vmul.f32 %v261_v53, %v257_v55  ;;  %v252_v61 = vstv %s251_s2  ;;  %p881_p0 = pnand %p880_p13, %p876_p10 }
  0x50   : > { %v273_v0 = vadd.f32 %v267_v56, %v252_v61  ;;  %v270_v1 = vadd.f32 %v264_v57, %v252_v61  ;;  %v326_v2 = vstv %s325_s17  ;;  %v268_v5 = vadd.f32 %v262_v58, %v252_v61 }
  0x51   : > { %311 = vrot.lane.b32.xlu2 %v303_v20, %s970_s21  ;;  %v269_v6 = vadd.f32 %v263_v59, %v252_v61  ;;  %v272_v7 = vadd.f32 %v266_v60, %v252_v61  ;;  %v327_v8 = vmul.f32 0.0, %v326_v2  ;;  %v328_v10 = vmul.f32 %v326_v2, %v1148_v9 }
  0x52   : > { %366 = vrot.lane.b32.xlu1 %v363_v21, %s971_s29  ;;  %v265_v12 = vmul.f32 %v261_v53, %v1148_v9  ;;  %v412_v21 = vstv %s411_s25 }
  0x53   : > { %364 = vrot.lane.b32.xlu0 %v361_v17, %s971_s29  ;;  %v404_v17 = vld [vmem:[#allocation2 + $0x10] sm:$0xfc]  ;;  %v336_v19 = vrot.slane %v327_v8, 2  ;;  %v337_v20 = vrot.slane %v328_v10, 2  ;;  %v415_v34 = vmul.f32 0.0, %v412_v21  ;;  %v418_v37 = vmul.f32 %v412_v21, %v1179_v33 }
  0x55   : > { %v434_v54 = vrot.slane %v418_v37, 4 }
  0x59   : > { %368 = vrot.lane.b32.xlu2 %v362_v18, %s971_s29  ;;  %v330_v18 = vmul.f32 %v326_v2, %v1154_v13 }
  0x5a   : > { %391 = vrot.lane.b32.xlu1 %v388_v28, %s970_s21  ;;  %v413_v28 = vmul.f32 %v412_v21, %v404_v17 }
  0x5b   : > { %389 = vrot.lane.b32.xlu0 %v386_v24, %s970_s21  ;;  %v271_v24 = vadd.f32 %v265_v12, %v252_v61  ;;  %v340_v32 = vrot.slane %v330_v18, 2 }
  0x5c   : > { %v426_v41 = vrot.slane %v413_v28, 4 }
  0x5d   : > { %v341_v61 = vsel %vm335_vm3, %v337_v20, %v340_v32 }
  0x61   : > { %393 = vrot.lane.b32.xlu2 %v387_v25, %s970_s21 }
  0x62   : > { %464 = vrot.lane.b32.xlu1 %v459_v36, %s971_s29  ;;  %v416_v36 = vmul.f32 %v412_v21, %v1154_v13 }
  0x63   : > { %462 = vrot.lane.b32.xlu0 %v457_v31, %s971_s29 }
  0x64   : > { %v430_v53 = vrot.slane %v416_v36, 4 }
  0x69   : > { %466 = vrot.lane.b32.xlu2 %v461_v42, %s971_s29 }
  0x6a   : > { %493 = vrot.lane.b32.xlu1 %v488_v44, %s970_s21 }
  0x6b   : > { %491 = vrot.lane.b32.xlu0 %v486_v40, %s970_s21  ;;  %v414_v40 = vmul.f32 %v412_v21, %v1171_v26 }
  0x6d   : > { %v427_v56 = vrot.slane %v414_v40, 4 }
  0x71   : > { %495 = vrot.lane.b32.xlu2 %v490_v46, %s970_s21 }
  0xa3   : > { %v1196_v47 = vpop.permute.xlu2 %309 }
  0xab   : > { %v312_v50 = vpop.permute.xlu2 %311 }
  0xb3   : > { %v369_v62 = vpop.permute.xlu2 %368 }
  0xb4   : > { %v308_v48 = vpop.permute.xlu1 %307 }
  0xb5   : > { %v284_v49 = vpop.permute.xlu0 %283 }
  0xb6   : > { %v292_v14 = vadd.f32 %v284_v49, %v268_v5  ;;  %v293_v15 = vadd.f32 %v284_v49, %v269_v6  ;;  %v428_v49 = vrot.slane %v415_v34, 4 }
  0xb8   : > { %v316_v29 = vadd.f32 %v308_v48, %v292_v14  ;;  %v317_v30 = vadd.f32 %v308_v48, %v293_v15  ;;  %v417_v48 = vmul.f32 %v412_v21, %v408_v35  ;;  %v429_v57 = vsel %vm425_vm4, %v426_v41, %v428_v49 }
  0xba   : > { %v348_v44 = vadd.f32 %v336_v19, %v316_v29  ;;  %v349_v45 = vadd.f32 %v337_v20, %v317_v30 }
  0xbb   : > { %v394_v31 = vpop.permute.xlu2 %393 }
  0xbc   : > { %v288_v51 = vpop.permute.xlu1 %287 }
  0xbd   : > { %v286_v52 = vpop.permute.xlu0 %285  ;;  %v297_v11 = vadd.f32 %v288_v51, %v273_v0  ;;  %v296_v16 = vadd.f32 %v288_v51, %v272_v7  ;;  %v432_v0 = vrot.slane %v417_v48, 4 }
  0xbe   : > { %v294_v3 = vadd.f32 %v286_v52, %v270_v1  ;;  %v295_v42 = vadd.f32 %v286_v52, %v271_v24 }
  0xbf   : > { %v321_v23 = vadd.f32 %v312_v50, %v297_v11  ;;  %v320_v9 = vadd.f32 %v312_v50, %v296_v16  ;;  %v433_v11 = vsel %vm425_vm4, %v428_v49, %v432_v0 }
  0xc0   : > { %v318_v25 = vadd.f32 %v1196_v47, %v294_v3  ;;  %v319_v52 = vadd.f32 %v1196_v47, %v295_v42 }
  0xc1   : > { %v353_v38 = vadd.f32 %v340_v32, %v321_v23  ;;  %v352_v43 = vadd.f32 %v336_v19, %v320_v9  ;;  %v431_v23 = vsel %vm425_vm4, %v427_v56, %v430_v53 }
  0xc2   : > { %v350_v39 = vadd.f32 %v336_v19, %v318_v25  ;;  %v351_v7 = vadd.f32 %v341_v61, %v319_v52 }
  0xc3   : > { %v378_v55 = vadd.f32 %v369_v62, %v353_v38  ;;  %v377_v58 = vadd.f32 %v369_v62, %v352_v43  ;;  %v467_v1 = vpop.permute.xlu2 %466 }
  0xc4   : > { %v1204_v63 = vpop.permute.xlu1 %366 }
  0xc5   : > { %v365_v4 = vpop.permute.xlu0 %364  ;;  %v375_v46 = vadd.f32 %v1204_v63, %v350_v39  ;;  %v403_v2 = vadd.f32 %v394_v31, %v378_v55  ;;  %v402_v6 = vadd.f32 %v394_v31, %v377_v58  ;;  %v376_v47 = vadd.f32 %v1204_v63, %v351_v7 }
  0xc6   : > { %v373_v50 = vadd.f32 %v365_v4, %v348_v44  ;;  %v374_v51 = vadd.f32 %v365_v4, %v349_v45  ;;  %v435_v4 = vsel %vm425_vm4, %v430_v53, %v434_v54 }
  0xc7   : > { %v447_v15 = vadd.f32 %v435_v4, %v403_v2  ;;  %v446_v18 = vadd.f32 %v433_v11, %v402_v6 }
  0xc9   : > { %v476_v24 = vadd.f32 %v467_v1, %v447_v15  ;;  %v475_v63 = vadd.f32 %v467_v1, %v446_v18 }
  0xcb   : > { %v496_v25 = vpop.permute.xlu2 %495 }
  0xcc   : > { %v392_v22 = vpop.permute.xlu1 %391  ;;  %v505_v29 = vadd.f32 %v496_v25, %v476_v24  ;;  %v504_v30 = vadd.f32 %v496_v25, %v475_v63 }
  0xcd   : > { %v390_v27 = vpop.permute.xlu0 %389  ;;  %v400_v33 = vadd.f32 %v392_v22, %v375_v46  ;;  %v401_v19 = vadd.f32 %v392_v22, %v376_v47 }
  0xce   : > { %v398_v59 = vadd.f32 %v390_v27, %v373_v50  ;;  %v399_v60 = vadd.f32 %v390_v27, %v374_v51 }
  0xcf   : > { %v444_v5 = vadd.f32 %v429_v57, %v400_v33  ;;  %v445_v27 = vadd.f32 %v431_v23, %v401_v19 }
  0xd0   : > { %v442_v8 = vadd.f32 %v426_v41, %v398_v59  ;;  %v443_v10 = vadd.f32 %v427_v56, %v399_v60 }
  0xd4   : > { %v465_v13 = vpop.permute.xlu1 %464 }
  0xd5   : > { %v463_v26 = vpop.permute.xlu0 %462  ;;  %v473_v12 = vadd.f32 %v465_v13, %v444_v5  ;;  %v474_v28 = vadd.f32 %v465_v13, %v445_v27 }
  0xd6   : > { %v471_v62 = vadd.f32 %v463_v26, %v442_v8  ;;  %v472_v3 = vadd.f32 %v463_v26, %v443_v10 }
  0xdc   : > { %v494_v14 = vpop.permute.xlu1 %493 }
  0xdd   : > { %v502_v16 = vadd.f32 %v494_v14, %v473_v12  ;;  %v492_v17 = vpop.permute.xlu0 %491  ;;  %v503_v9 = vadd.f32 %v494_v14, %v474_v28 }
  0xde   : > { %v500_v20 = vadd.f32 %v492_v17, %v471_v62  ;;  %v501_v21 = vadd.f32 %v492_v17, %v472_v3 }
  0xdf   : > { %516 = vrot.lane.b32.xlu2 %v502_v16, %s972_s19 }
  0xe0   : > { %514 = vrot.lane.b32.xlu1 %v501_v21, %s972_s19  ;;  %512 = vrot.lane.b32.xlu0 %v500_v20, %s972_s19 }
  0xe7   : > { %522 = vrot.lane.b32.xlu2 %v505_v29, %s972_s19 }
  0xe8   : > { %520 = vrot.lane.b32.xlu1 %v504_v30, %s972_s19  ;;  %518 = vrot.lane.b32.xlu0 %v503_v9, %s972_s19 }
 0x139   : > { %v517_v22 = vpop.permute.xlu2 %516 }
 0x141   : > { %v523_v35 = vpop.permute.xlu2 %522 }
 0x152   : > { %v515_v31 = vpop.permute.xlu1 %514  ;;  %v513_v32 = vpop.permute.xlu0 %512 }
 0x153   : > { %v525_v34 = vsel %vm524_vm5, %v513_v32, %v515_v31 }
 0x154   : > { %532 = vst.msk [vmem:[%s235_s11 - $0x6] sm:$0xc0] %vm531_vm6, %v525_v34 }
 0x15a   : > { %v521_v36 = vpop.permute.xlu1 %520  ;;  %v519_v37 = vpop.permute.xlu0 %518 }
 0x15b   : > { %v527_v38 = vsel %vm524_vm5, %v521_v36, %v523_v35  ;;  %v526_v39 = vsel %vm524_vm5, %v517_v22, %v519_v37 }
 0x15c   : > { %535 = vst.msk [vmem:[%s235_s11 + $0xa] sm:$0x3f] %vm534_vm7, %v527_v38 }
 0x15d   : > { %533 = vst.msk [vmem:[%s235_s11 + $0x2] sm:$0xff] %vm248_vm1, %v526_v39 }
 0x15e   : > { %884 = shalt.err (!%p881_p0)
}
 0x15f   : > { %s973_s24 = smov 128   ;;  %s974_s17 = smov 8  }
 0x160   : > { %700 = dma.vmem_to_hbm [thread:$0]  (%p1057_p8), %s552_s30, 256, %s554_s15, %s537_s16, %s973_s24, %s973_s24, %s974_s17  }
 0x161 PF: > { %s1298_s22 = sld [smem:[#allocation17_spill]] }
 0x162   : > { %s1299_s25 = sld [smem:[#allocation15_spill]] }
 0x167   : > { %p722_p1 = scmp.ge.s32.totalorder %s1298_s22, 2 }
 0x168   : > { %s568_s27 = sand.u32 1, %s1299_s25  }
 0x169   : > { %p714_p2 = pnand %p722_p1, %p1061_p9  ;;  %s569_s4 = scalar_lea.sflag [#allocation5], %s568_s27 }
 0x16b   : > { %p715_p4 = pneg %p714_p2 }
 0x16d   : > { %930 = dma.done.wait (%p715_p4), %s569_s4, 256  }
 0x16e   : > { %932 = vsyncadd (%p715_p4), %s569_s4, 4294967040  ;;  %s21_s19 = sadd.s32 1, %s1298_s22   ;;  %s1301_s8 = smov %s1108_s12 }
 0x16f   : > { %p18_p5 = scmp.ge.s32.totalorder %s21_s19, 10   ;;  %s1302_s15 = sld [smem:[#allocation16_spill]] }
 0x170   : > { %s1303_s17 = sld [smem:[#allocation19_spill]]  ;;  %s1304_s12 = smov %s939_s13 }
 0x171   : > { %s1305_s13 = smov %s943_s14  ;;  %s1306_s14 = smov %s1301_s8 }
 0x172   : > { %s1307_s16 = smov %s959_s18  ;;  %s1308_s18 = smov %s1314_s20 }
 0x173   :  { %20 = sbr.rel (!%p18_p5) target bundleno = 12 (0xc), region = 87 }
 0x178   :  { %575 = vsyncpa [#allocation4], 1 }
 0x179   :  { %577 = vsyncpa [#allocation4 + $0x1], 1 }
 0x17a   :  { %578 = vsyncpa [#allocation5], 1 }
 0x17b   :  { %580 = vsyncpa [#allocation5 + $0x1], 1 }
 0x17c   :  { %581 = vsyncpa [#allocation6], 1 }
 0x17d   :  { %583 = vsyncpa [#allocation6 + $0x1], 1 }
 0x17e   :  { %584 = vsyncpa [#allocation7], 1 }
 0x17f   :  { %586 = vsyncpa [#allocation7 + $0x1], 1 }

</bundles_post_ra>
